<compile_context>
chip_gen: v7x
topology: tpu7x:2x2x1
jax: 0.10.0
libtpu: 0.0.40
codegen_flags: <defaults>
</compile_context>

<pallas_src>
import jax
import jax.numpy as jnp
from jax.experimental import pallas as pl
from jax.experimental.pallas import tpu as pltpu


def _round_up(x, m):
    return (x + m - 1) // m * m


def detect_1x1_kernel(x_ref, w_ref, b_ref, o_ref):
    # x_ref: (1, C, TL)  w_ref: (NO, C)  b_ref: (NO, 1) f32  o_ref: (1, NO, TL)
    y = jnp.dot(w_ref[...], x_ref[0], preferred_element_type=jnp.float32)
    o_ref[0] = (y + b_ref[...]).astype(o_ref.dtype)


def _detect_pallas_call(x, w, b, out_dtype, *, TL, single_buffer_wb, vmem_limit):
    B, C, L = x.shape
    NO = w.shape[0]
    wb_kw = dict(pipeline_mode=pl.Buffered(1)) if single_buffer_wb else {}
    return pl.pallas_call(
        detect_1x1_kernel,
        out_shape=jax.ShapeDtypeStruct((B, NO, L), out_dtype),
        grid=(B, pl.cdiv(L, TL)),
        in_specs=[
            pl.BlockSpec((1, C, TL), lambda bi, li: (bi, 0, li)),
            pl.BlockSpec((NO, C), lambda bi, li: (0, 0), **wb_kw),
            pl.BlockSpec((NO, 1), lambda bi, li: (0, 0), **wb_kw),
        ],
        out_specs=pl.BlockSpec((1, NO, TL), lambda bi, li: (bi, 0, li)),
        compiler_params=pltpu.CompilerParams(
            dimension_semantics=("parallel", "parallel"),
            vmem_limit_bytes=vmem_limit),
    )(x, w, b)


def detect_level(x_nchw, w_oihw, bias, *, tile_l=4096,
                 compute_dtype=jnp.bfloat16):
    """1x1 Conv2d with bias: (B, C, H, W) -> (B, NO, H, W), NCHW in and out."""
    B, C, H, W = x_nchw.shape
    NO = w_oihw.shape[0]
    L = H * W

    x = x_nchw.reshape(B, C, L).astype(compute_dtype)   # free reshape; bf16 I/O
    w = w_oihw.reshape(NO, C).astype(compute_dtype)
    b = bias.reshape(NO, 1).astype(jnp.float32)          # bias added in f32

    # Lane-dense pixel tile, large enough to amortize per-step overhead.
    TL = min(tile_l, _round_up(L, 128))
    if B == 1 and L > 128:
        # Both grid axes are "parallel": keep >=2 blocks so v7x's 2 TCs get work.
        TL = min(TL, _round_up(pl.cdiv(L, 2), 128))

    # VMEM budget: double-buffered x/out pixel blocks + weight/bias copies.
    itemsize = jnp.dtype(compute_dtype).itemsize
    working_set = 2 * (C + NO) * TL * itemsize + 2 * NO * (C * itemsize + 4)
    vmem_limit = min(max(int(1.5 * working_set) + (2 << 20), 16 << 20), 64 << 20)

    try:
        out = _detect_pallas_call(x, w, b, compute_dtype, TL=TL,
                                  single_buffer_wb=True, vmem_limit=vmem_limit)
    except Exception:
        # pipeline_mode=pl.Buffered(1) unsupported on this JAX version: the
        # grid-invariant weight/bias simply get the default double buffer.
        out = _detect_pallas_call(x, w, b, compute_dtype, TL=TL,
                                  single_buffer_wb=False, vmem_limit=vmem_limit)
    return out.reshape(B, NO, H, W)


def detect_forward(xs, weights, biases, *, tile_l=4096,
                   compute_dtype=jnp.bfloat16):
    """Pallas implementation of Detect.forward: list of per-level 1x1 convs."""
    # NOTE: a single fused pallas_call over all levels (scalar-prefetched
    # per-level offsets, weights zero-padded to max C) would save two launch /
    # pipeline prologue-epilogue bubbles; kept per-level here for clarity and
    # to avoid the wrapper-side channel padding it requires.
    return [detect_level(x, w, b, tile_l=tile_l, compute_dtype=compute_dtype)
            for x, w, b in zip(xs, weights, biases)]


def ref_forward(xs, weights, biases):
    """Pure-JAX reference mirroring the PyTorch module (f32, high precision)."""
    outs = []
    for x, w, b in zip(xs, weights, biases):
        NO, C = w.shape[0], w.shape[1]
        y = jnp.einsum("bchw,nc->bnhw", x, w.reshape(NO, C),
                       precision=jax.lax.Precision.HIGHEST)
        outs.append(y + b[None, :, None, None])
    return outs


if __name__ == "__main__":
    nc, reg_max = 80, 16
    no = nc + 4 * reg_max                       # 144 outputs per pixel
    ch = (32, 64, 128)                          # per-level input channels
    spatial = (16, 8, 4)                        # per-level feature-map sizes
    B = 2

    key = jax.random.PRNGKey(0)
    xs, ws, bs = [], [], []
    for c, s in zip(ch, spatial):
        key, k1, k2, k3 = jax.random.split(key, 4)
        xs.append(jax.random.normal(k1, (B, c, s, s), jnp.float32))
        ws.append(jax.random.normal(k2, (no, c, 1, 1), jnp.float32) * 0.05)
        bs.append(jax.random.normal(k3, (no,), jnp.float32) * 0.05)

    refs = ref_forward(xs, ws, bs)

    # f32 path: tight check of the kernel math.
    outs_f32 = jax.block_until_ready(
        detect_forward(xs, ws, bs, compute_dtype=jnp.float32))
    for o, r, s in zip(outs_f32, refs, spatial):
        assert o.shape == (B, no, s, s), o.shape
        err = float(jnp.max(jnp.abs(o - r)))
        assert jnp.allclose(o, r, atol=1e-2, rtol=1e-2), err

    # bf16 path (default perf config): loosened tolerance for bf16 I/O.
    outs_bf16 = jax.block_until_ready(detect_forward(xs, ws, bs))
    for o, r, s in zip(outs_bf16, refs, spatial):
        assert o.shape == (B, no, s, s), o.shape
        assert o.dtype == jnp.bfloat16, o.dtype
        o32 = o.astype(jnp.float32)
        err = float(jnp.max(jnp.abs(o32 - r)))
        assert jnp.allclose(o32, r, atol=6e-2, rtol=6e-2), err

    print("KERNEL_OK")
</pallas_src>

<mosaic_0001>
module attributes {stable_mosaic.version = 11 : i64} {
  func.func @detect_1x1_kernel(%arg0: i32, %arg1: i32, %arg2: memref<1x32x256xf32, #tpu.memory_space<vmem>>, %arg3: memref<144x32xf32, #tpu.memory_space<vmem>>, %arg4: memref<144x1xf32, #tpu.memory_space<vmem>>, %arg5: memref<1x144x256xf32, #tpu.memory_space<vmem>>) attributes {dimension_semantics = [#tpu.dimension_semantics<parallel>, #tpu.dimension_semantics<parallel>], iteration_bounds = array<i64: 2, 1>, scalar_prefetch = 0 : i64, scratch_operands = 0 : i64, tpu.core_type = #tpu.core_type<tc>, window_params = [{transform_indices = @transform_0, window_bounds = array<i64: 1, 32, 256>}, {pipeline_mode = #tpu.pipeline_mode<synchronous>, transform_indices = @transform_1, window_bounds = array<i64: 144, 32>}, {pipeline_mode = #tpu.pipeline_mode<synchronous>, transform_indices = @transform_2, window_bounds = array<i64: 144, 1>}, {transform_indices = @transform_3, window_bounds = array<i64: 1, 144, 256>}]} {
    %c0 = arith.constant 0 : index
    %c0_0 = arith.constant 0 : index
    %0 = vector.load %arg3[%c0, %c0_0] : memref<144x32xf32, #tpu.memory_space<vmem>>, vector<144x32xf32>
    %c0_1 = arith.constant 0 : index
    %c0_2 = arith.constant 0 : index
    %c0_3 = arith.constant 0 : index
    %1 = vector.load %arg2[%c0_1, %c0_2, %c0_3] : memref<1x32x256xf32, #tpu.memory_space<vmem>>, vector<1x32x256xf32>
    %2 = vector.shape_cast %1 : vector<1x32x256xf32> to vector<32x256xf32>
    %cst = arith.constant dense<0.000000e+00> : vector<144x256xf32>
    %3 = tpu.matmul %0, %2, %cst {dimension_numbers = #tpu.dot_dimension_numbers<[1], [0], [0], [1], [0, 0, 1, 1], [], []>} : vector<144x32xf32>, vector<32x256xf32>, vector<144x256xf32> -> vector<144x256xf32>
    %c0_4 = arith.constant 0 : index
    %c0_5 = arith.constant 0 : index
    %4 = vector.load %arg4[%c0_4, %c0_5] : memref<144x1xf32, #tpu.memory_space<vmem>>, vector<144x1xf32>
    %5 = vector.broadcast %4 : vector<144x1xf32> to vector<144x256xf32>
    %6 = arith.addf %3, %5 : vector<144x256xf32>
    %c0_6 = arith.constant 0 : index
    %c0_7 = arith.constant 0 : index
    %c0_8 = arith.constant 0 : index
    %7 = vector.load %arg5[%c0_6, %c0_7, %c0_8] : memref<1x144x256xf32, #tpu.memory_space<vmem>>, vector<1x144x256xf32>
    %8 = vector.shape_cast %7 : vector<1x144x256xf32> to vector<144x256xf32>
    %9 = vector.shape_cast %6 : vector<144x256xf32> to vector<1x144x256xf32>
    tpu.vector_store %arg5[%c0_6, %c0_7, %c0_8], %9 {strides = array<i32>} : memref<1x144x256xf32, #tpu.memory_space<vmem>>, vector<1x144x256xf32>,
    return
  }
  func.func @transform_0(%arg0: i32, %arg1: i32) -> (i32, i32, i32) {
    %c0_i32 = arith.constant 0 : i32
    %c0_i32_0 = arith.constant 0 : i32
    return %arg0, %c0_i32, %arg1 : i32, i32, i32
  }
  func.func @transform_1(%arg0: i32, %arg1: i32) -> (i32, i32) {
    %c0_i32 = arith.constant 0 : i32
    %c0_i32_0 = arith.constant 0 : i32
    %c0_i32_1 = arith.constant 0 : i32
    return %c0_i32, %c0_i32_0 : i32, i32
  }
  func.func @transform_2(%arg0: i32, %arg1: i32) -> (i32, i32) {
    %c0_i32 = arith.constant 0 : i32
    %c0_i32_0 = arith.constant 0 : i32
    %c0_i32_1 = arith.constant 0 : i32
    return %c0_i32, %c0_i32_0 : i32, i32
  }
  func.func @transform_3(%arg0: i32, %arg1: i32) -> (i32, i32, i32) {
    %c0_i32 = arith.constant 0 : i32
    %c0_i32_0 = arith.constant 0 : i32
    return %arg0, %c0_i32, %arg1 : i32, i32, i32
  }
}

module attributes {stable_mosaic.version = 11 : i64} {
  func.func @detect_1x1_kernel(%arg0: i32, %arg1: i32, %arg2: memref<1x32x256xf32, #tpu.memory_space<vmem>>, %arg3: memref<144x32xf32, #tpu.memory_space<vmem>>, %arg4: memref<144x1xf32, #tpu.memory_space<vmem>>, %arg5: memref<1x144x256xf32, #tpu.memory_space<vmem>>) attributes {dimension_semantics = [#tpu.dimension_semantics<parallel>, #tpu.dimension_semantics<parallel>], iteration_bounds = array<i64: 2, 1>, scalar_prefetch = 0 : i64, scratch_operands = 0 : i64, tpu.core_type = #tpu.core_type<tc>, window_params = [{transform_indices = @transform_0, window_bounds = array<i64: 1, 32, 256>}, {pipeline_mode = #tpu.pipeline_mode<synchronous>, transform_indices = @transform_1, window_bounds = array<i64: 144, 32>}, {pipeline_mode = #tpu.pipeline_mode<synchronous>, transform_indices = @transform_2, window_bounds = array<i64: 144, 1>}, {transform_indices = @transform_3, window_bounds = array<i64: 1, 144, 256>}]} {
    %c0 = arith.constant 0 : index
    %c0_0 = arith.constant 0 : index
    %0 = vector.load %arg3[%c0, %c0_0] : memref<144x32xf32, #tpu.memory_space<vmem>>, vector<144x32xf32>
    %c0_1 = arith.constant 0 : index
    %c0_2 = arith.constant 0 : index
    %c0_3 = arith.constant 0 : index
    %1 = vector.load %arg2[%c0_1, %c0_2, %c0_3] : memref<1x32x256xf32, #tpu.memory_space<vmem>>, vector<1x32x256xf32>
    %2 = vector.shape_cast %1 : vector<1x32x256xf32> to vector<32x256xf32>
    %cst = arith.constant dense<0.000000e+00> : vector<144x256xf32>
    %3 = tpu.matmul %0, %2, %cst {dimension_numbers = #tpu.dot_dimension_numbers<[1], [0], [0], [1], [0, 0, 1, 1], [], []>} : vector<144x32xf32>, vector<32x256xf32>, vector<144x256xf32> -> vector<144x256xf32>
    %c0_4 = arith.constant 0 : index
    %c0_5 = arith.constant 0 : index
    %4 = vector.load %arg4[%c0_4, %c0_5] : memref<144x1xf32, #tpu.memory_space<vmem>>, vector<144x1xf32>
    %5 = vector.broadcast %4 : vector<144x1xf32> to vector<144x256xf32>
    %6 = arith.addf %3, %5 : vector<144x256xf32>
    %c0_6 = arith.constant 0 : index
    %c0_7 = arith.constant 0 : index
    %c0_8 = arith.constant 0 : index
    %7 = vector.load %arg5[%c0_6, %c0_7, %c0_8] : memref<1x144x256xf32, #tpu.memory_space<vmem>>, vector<1x144x256xf32>
    %8 = vector.shape_cast %7 : vector<1x144x256xf32> to vector<144x256xf32>
    %9 = vector.shape_cast %6 : vector<144x256xf32> to vector<1x144x256xf32>
    tpu.vector_store %arg5[%c0_6, %c0_7, %c0_8], %9 {strides = array<i32>} : memref<1x144x256xf32, #tpu.memory_space<vmem>>, vector<1x144x256xf32>,
    return
  }
  func.func @transform_0(%arg0: i32, %arg1: i32) -> (i32, i32, i32) {
    %c0_i32 = arith.constant 0 : i32
    %c0_i32_0 = arith.constant 0 : i32
    return %arg0, %c0_i32, %arg1 : i32, i32, i32
  }
  func.func @transform_1(%arg0: i32, %arg1: i32) -> (i32, i32) {
    %c0_i32 = arith.constant 0 : i32
    %c0_i32_0 = arith.constant 0 : i32
    %c0_i32_1 = arith.constant 0 : i32
    return %c0_i32, %c0_i32_0 : i32, i32
  }
  func.func @transform_2(%arg0: i32, %arg1: i32) -> (i32, i32) {
    %c0_i32 = arith.constant 0 : i32
    %c0_i32_0 = arith.constant 0 : i32
    %c0_i32_1 = arith.constant 0 : i32
    return %c0_i32, %c0_i32_0 : i32, i32
  }
  func.func @transform_3(%arg0: i32, %arg1: i32) -> (i32, i32, i32) {
    %c0_i32 = arith.constant 0 : i32
    %c0_i32_0 = arith.constant 0 : i32
    return %arg0, %c0_i32, %arg1 : i32, i32, i32
  }
}

</mosaic_0001>

<bundles_post_ra>
// kernel: tpu_custom_call.1
= control target key start
LH: loop header
LB: loop body
LE: loop exit
PB: predicated region body
PF: predicated region fallthrough
CT: control target
= control target key end

     0   :  { %8 = vsyncpa [#allocation3], 0  ;;  %s1224_s0 = inlined_call_operand.vmem [shape: f32[2,32,256], index: 0, kind: input, shape index: {}]   ;;  %s1225_s1 = inlined_call_operand.vmem [shape: f32[144,32], index: 1, kind: input, shape index: {}]   ;;  %s1226_s2 = inlined_call_operand.vmem [shape: f32[144,1], index: 2, kind: input, shape index: {}]   ;;  %s1227_s3 = inlined_call_operand.hbm [shape: f32[2,144,256], index: 3, kind: output, shape index: {}]  }
   0x1   :  { %10 = vsyncpa [#allocation3 + $0x1], 0  ;;  %s902_s12 = smov 0   ;;  %s904_s13 = smov 0  }
   0x2   :  { %s906_s14 = smov 0   ;;  %s908_s15 = smov 0  }
   0x3   :  { %s910_s16 = smov 0   ;;  %s912_s17 = smov 0  }
   0x4 LB: > { %s693_s18 = sadd.s32 4294967295, %s875_s17   ;;  %s694_s19 = sadd.s32 4294967294, %s875_s17   ;;  %s875_s17 = sphi %s912_s17, %s16_s17   ;;  %s871_s16 = sphi %s910_s16, %s1234_s16   ;;  %s867_s15 = sphi %s908_s15, %s1233_s15   ;;  %s863_s14 = sphi %s906_s14, %s1232_s14   ;;  %s859_s13 = sphi %s904_s13, %s1231_s13   ;;  %s855_s12 = sphi %s902_s12, %s1230_s12  }
   0x5   : > { %s28_s20 = sadd.s32 1, %s871_s16  ;;  %s107_s21 = sadd.s32 1, %s863_s14 }
   0x6   : > { %p30_p0 = scmp.ge.s32.totalorder %s28_s20, 2  ;;  %p117_p1 = scmp.ne.s32.totalorder %s863_s14, %s859_s13 }
   0x7   : > { %p118_p2 = scmp.eq.s32.totalorder %s693_s18, 1  ;;  %p123_p3 = scmp.ne.s32.totalorder %s859_s13, %s855_s12 }
   0x8   : > { %s1236_s20 = smov (%p30_p0, %s28_s20), 0  ;;  %p124_p5 = scmp.eq.s32.totalorder %s694_s19, 1 }
   0x9   : > { %p942_p4 = por %p118_p2, %p117_p1  ;;  %s102_s23 = ssub.s32 %s871_s16, %s1236_s20 }
   0xa   : > { %p697_p6 = scmp.ge.s32.totalorder %s875_s17, 1  ;;  %p105_p7 = scmp.eq.s32.totalorder %s102_s23, 0 }
   0xb   : > { %p949_p8 = por %p124_p5, %p123_p3  ;;  %p161_p9 = scmp.lt.s32.totalorder %s875_s17, 3 }
   0xc   : > { %s955_s25 = scalar_select %p105_p7, %s863_s14, %s107_s21  }
   0xd   : > { %p162_p10 = pnand %p697_p6, %p161_p9 }
   0xe   : > { %p190_p11 = scmp.lt.s32.totalorder (!%p162_p10), %s867_s15, 1  ;;  %v877_v0 = vmov (!%p162_p10), 0.0   ;;  %v878_v1 = vmov (!%p162_p10), 0   ;;  %v228_v13 = vld [vmem:[%s1226_s2 + $0x10] sm:$0xff] (!%p162_p10)  ;;  %v226_v14 = vld [vmem:[%s1226_s2] sm:$0xff] (!%p162_p10)  ;;  %v229_v16 = vld [vmem:[%s1226_s2 + $0x18] sm:$0xff] (!%p162_p10) }
   0xf   : > { %165 = sbr.rel (%p162_p10) target bundleno = 299 (0x12b), region = 32  ;;  %453 = vmatprep.mubr.f32.mxu0 (!%p162_p10), %v877_v0  ;;  %507 = vmatprep.mubr.f32.mxu1 (!%p162_p10), %v877_v0  ;;  %v227_v17 = vld [vmem:[%s1226_s2 + $0x8] sm:$0xff] (!%p162_p10)  ;;  %v200_v18 = vld [vmem:[%s1225_s1] sm:$0xff] (!%p162_p10)  ;;  %vm334_vm0 = vcmask (!%p162_p10), 261120   ;;  %v210_v23 = vld [vmem:[%s1225_s1 + $0x50] sm:$0xff] (!%p162_p10)  ;;  %s186_s8 = sand.u32 (!%p162_p10), 1, %s859_s13  }
  0x10   : > { %796 = vset.pattern.permute.xlu1 (!%p162_p10), %v878_v1  ;;  %795 = vset.pattern.permute.xlu0 (!%p162_p10), %v878_v1  ;;  %v209_v19 = vld [vmem:[%s1225_s1 + $0x48] sm:$0xff] (!%p162_p10)  ;;  %v230_v21 = vld [vmem:[%s1226_s2 + $0x20] sm:$0xff] (!%p162_p10)  ;;  %v233_v24 = vld [vmem:[%s1226_s2 + $0x38] sm:$0xff] (!%p162_p10)  ;;  %s734_s9 = smul.u32 (!%p162_p10), 288, %s186_s8  ;;  %s1178_s23 = scalar_lea.sflag (!%p162_p10), [#allocation3], %s186_s8 }
  0x11   : > { %256 = vperm.xlu1 (!%p162_p10), %796, %v228_v13   ;;  %246 = vperm.xlu0 (!%p162_p10), %795, %v226_v14   ;;  %v231_v20 = vld [vmem:[%s1226_s2 + $0x28] sm:$0xff] (!%p162_p10)  ;;  %v232_v25 = vld [vmem:[%s1226_s2 + $0x30] sm:$0xff] (!%p162_p10)  ;;  %v211_v27 = vld [vmem:[%s1225_s1 + $0x58] sm:$0xff] (!%p162_p10)  ;;  %s735_s11 = smul.u32 (!%p162_p10), 4608, %s867_s15 }
  0x12   : > { %v201_v22 = vld [vmem:[%s1225_s1 + $0x8] sm:$0xff] (!%p162_p10)  ;;  %v202_v26 = vld [vmem:[%s1225_s1 + $0x10] sm:$0xff] (!%p162_p10)  ;;  %v234_v29 = vld [vmem:[%s1226_s2 + $0x40] sm:$0xff] (!%p162_p10)  ;;  %s1119_s10 = scalar_lea.vmem (!%p162_p10), [#allocation2], %s734_s9 }
  0x13   : > { %v235_v28 = vld [vmem:[%s1226_s2 + $0x48] sm:$0xff] (!%p162_p10)  ;;  %v203_v30 = vld [vmem:[%s1225_s1 + $0x18] sm:$0xff] (!%p162_p10)  ;;  %v212_v31 = vld [vmem:[%s1225_s1 + $0x60] sm:$0xff] (!%p162_p10)  ;;  %s614_s18 = sshll.u32 (!%p162_p10), %s1119_s10, 4  ;;  %s1167_s21 = scalar_lea.hbm (!%p162_p10), %s1227_s3, %s735_s11  ;;  %s1169_s18 = int_to_ptr.vmem [resolvable:$true] %s614_s18 }
  0x14   : > { %v237_v32 = vld [vmem:[%s1226_s2 + $0x58] sm:$0xff] (!%p162_p10)  ;;  %v236_v33 = vld [vmem:[%s1226_s2 + $0x50] sm:$0xff] (!%p162_p10)  ;;  %v204_v34 = vld [vmem:[%s1225_s1 + $0x20] sm:$0xff] (!%p162_p10) }
  0x15   : > { %261 = vperm.xlu1 (!%p162_p10), %796, %v229_v16   ;;  %251 = vperm.xlu0 (!%p162_p10), %795, %v227_v17   ;;  %v213_v35 = vld [vmem:[%s1225_s1 + $0x68] sm:$0xff] (!%p162_p10)  ;;  %v238_v37 = vld [vmem:[%s1226_s2 + $0x60] sm:$0xff] (!%p162_p10)  ;;  %v214_v39 = vld [vmem:[%s1225_s1 + $0x70] sm:$0xff] (!%p162_p10) }
  0x16   : > { %s191_s26 = scalar_select %p190_p11, %s867_s15, 1  ;;  %v239_v36 = vld [vmem:[%s1226_s2 + $0x68] sm:$0xff]  ;;  %v241_v40 = vld [vmem:[%s1226_s2 + $0x78] sm:$0xff]  ;;  %v240_v41 = vld [vmem:[%s1226_s2 + $0x70] sm:$0xff] }
  0x17   : > { %v205_v38 = vld [vmem:[%s1225_s1 + $0x28] sm:$0xff]  ;;  %v206_v42 = vld [vmem:[%s1225_s1 + $0x30] sm:$0xff]  ;;  %v215_v43 = vld [vmem:[%s1225_s1 + $0x78] sm:$0xff] }
  0x18   : > { %s721_s27 = sshll.u32 %s191_s26, 6  ;;  %v243_v44 = vld [vmem:[%s1226_s2 + $0x88] sm:$0xff]  ;;  %v242_v45 = vld [vmem:[%s1226_s2 + $0x80] sm:$0xff]  ;;  %v207_v46 = vld [vmem:[%s1225_s1 + $0x38] sm:$0xff]  ;;  %s797_s26 = scalar_lea.vmem %s1169_s18, 4608 }
  0x19   : > { %s197_s30 = scalar_lea.vmem %s1224_s0, %s721_s27  ;;  %271 = vperm.xlu1 %796, %v231_v20   ;;  %266 = vperm.xlu0 %795, %v230_v21   ;;  %v216_v47 = vld [vmem:[%s1225_s1 + $0x80] sm:$0xff]  ;;  %v217_v49 = vld [vmem:[%s1225_s1 + $0x88] sm:$0xff]  ;;  %p798_p12 = scmp.ne.s32.totalorder %s1169_s18, %s797_s26 }
  0x1a   : > { %v219_v2 = vld [vmem:[%s197_s30 + $0x8] sm:$0xff]  ;;  %v221_v3 = vld [vmem:[%s197_s30 + $0x18] sm:$0xff]  ;;  %v218_v4 = vld [vmem:[%s197_s30] sm:$0xff]  ;;  %s879_s27 = smov [#allocation2]  }
  0x1b   : > { %v722_v5 = vpack.c.bf16 %v221_v3, %v219_v2  ;;  %v220_v6 = vld [vmem:[%s197_s30 + $0x10] sm:$0xff]  ;;  %v223_v7 = vld [vmem:[%s197_s30 + $0x28] sm:$0xff]  ;;  %v225_v8 = vld [vmem:[%s197_s30 + $0x38] sm:$0xff]  ;;  %p799_p13 = pnand %p798_p12, %p942_p4  ;;  %s801_s28 = sshll.u32 %s879_s27, 4  ;;  %s802_s28 = int_to_ptr.vmem [resolvable:$false] %s801_s28 }
  0x1c   : > { %v724_v9 = vpack.c.bf16 %v220_v6, %v218_v4  ;;  %v726_v10 = vpack.c.bf16 %v225_v8, %v223_v7  ;;  %v222_v11 = vld [vmem:[%s197_s30 + $0x20] sm:$0xff]  ;;  %v224_v12 = vld [vmem:[%s197_s30 + $0x30] sm:$0xff]  ;;  %s803_s29 = scalar_lea.vmem %s802_s28, 9216  ;;  %p804_p1 = scmp.lt.s32.totalorder %s1169_s18, %s802_s28 }
  0x1d   : > { %723 = vmatprep.subr.bf16.mxu0 %v722_v5  ;;  %730 = vmatprep.subr.bf16.mxu1 %v722_v5  ;;  %v728_v15 = vpack.c.bf16 %v224_v12, %v222_v11  ;;  %v208_v48 = vld [vmem:[%s1225_s1 + $0x40] sm:$0xff]  ;;  %p800_p0 = pneg %p799_p13  ;;  %p805_p2 = scmp.lt.s32.totalorder %s803_s29, %s797_s26 }
  0x1e   : > { %725 = vmatpush1.bf16.msra.mxu0 %v724_v9  ;;  %732 = vmatpush1.bf16.msra.mxu1 %v724_v9 }
  0x1f   : > { %727 = vmatprep.subr.bf16.mxu0 %v726_v10  ;;  %731 = vmatprep.subr.bf16.mxu1 %v726_v10  ;;  %p806_p3 = por %p805_p2, %p804_p1 }
  0x20   : > { %281 = vperm.xlu1 %796, %v233_v24   ;;  %276 = vperm.xlu0 %795, %v232_v25  }
  0x21   : > { %p807_p5 = pnand %p806_p3, %p800_p0 }
  0x22   : > { %729 = vmatpush1.bf16.msra.mxu0 %v728_v15  ;;  %733 = vmatpush1.bf16.msra.mxu1 %v728_v15 }
  0x24   : > { %291 = vperm.xlu1 %796, %v235_v28   ;;  %286 = vperm.xlu0 %795, %v234_v29  }
  0x25   : > { %700 = vmatmul.mubr.msk.f32.vlgmr.msra.gmra.mrb[0].mxu0 %vm334_vm0, %v200_v18  ;;  %709 = vmatmul.mubr.msk.f32.vlgmr.msra.gmra.mrb[0].mxu1 %vm334_vm0, %v209_v19 }
  0x26   : > { %459 = vmatprep.mubr.f32.mxu0 %v877_v0  ;;  %513 = vmatprep.mubr.f32.mxu1 %v877_v0 }
  0x28   : > { %301 = vperm.xlu1 %796, %v237_v32   ;;  %296 = vperm.xlu0 %795, %v236_v33  }
  0x29   : > { %701 = vmatmul.mubr.msk.f32.gmra.mrb[2].mxu0 %vm334_vm0, %v201_v22  ;;  %710 = vmatmul.mubr.msk.f32.gmra.mrb[2].mxu1 %vm334_vm0, %v210_v23 }
  0x2a   : > { %465 = vmatprep.mubr.f32.mxu0 %v877_v0  ;;  %519 = vmatprep.mubr.f32.mxu1 %v877_v0 }
  0x2c   : > { %311 = vperm.xlu1 %796, %v239_v36   ;;  %306 = vperm.xlu0 %795, %v238_v37  }
  0x2d   : > { %702 = vmatmul.mubr.msk.f32.gmra.mrb[4].mxu0 %vm334_vm0, %v202_v26  ;;  %711 = vmatmul.mubr.msk.f32.gmra.mrb[4].mxu1 %vm334_vm0, %v211_v27 }
  0x2e   : > { %471 = vmatprep.mubr.f32.mxu0 %v877_v0  ;;  %525 = vmatprep.mubr.f32.mxu1 %v877_v0 }
  0x30   : > { %321 = vperm.xlu1 %796, %v241_v40   ;;  %316 = vperm.xlu0 %795, %v240_v41  }
  0x31   : > { %703 = vmatmul.mubr.msk.f32.gmra.mrb[6].mxu0 %vm334_vm0, %v203_v30  ;;  %712 = vmatmul.mubr.msk.f32.gmra.mrb[6].mxu1 %vm334_vm0, %v212_v31 }
  0x32   : > { %477 = vmatprep.mubr.f32.mxu0 %v877_v0  ;;  %531 = vmatprep.mubr.f32.mxu1 %v877_v0 }
  0x34   : > { %331 = vperm.xlu1 %796, %v243_v44   ;;  %326 = vperm.xlu0 %795, %v242_v45  }
  0x35   : > { %704 = vmatmul.mubr.msk.f32.gmra.mrb[8].mxu0 %vm334_vm0, %v204_v34  ;;  %713 = vmatmul.mubr.msk.f32.gmra.mrb[8].mxu1 %vm334_vm0, %v213_v35 }
  0x36   : > { %483 = vmatprep.mubr.f32.mxu0 %v877_v0  ;;  %537 = vmatprep.mubr.f32.mxu1 %v877_v0 }
  0x39   : > { %705 = vmatmul.mubr.msk.f32.gmra.mrb[10].mxu0 %vm334_vm0, %v205_v38  ;;  %714 = vmatmul.mubr.msk.f32.gmra.mrb[10].mxu1 %vm334_vm0, %v214_v39 }
  0x3a   : > { %489 = vmatprep.mubr.f32.mxu0 %v877_v0  ;;  %543 = vmatprep.mubr.f32.mxu1 %v877_v0 }
  0x3d   : > { %706 = vmatmul.mubr.msk.f32.gmra.mrb[12].mxu0 %vm334_vm0, %v206_v42  ;;  %715 = vmatmul.mubr.msk.f32.gmra.mrb[12].mxu1 %vm334_vm0, %v215_v43 }
  0x3e   : > { %495 = vmatprep.mubr.f32.mxu0 %v877_v0  ;;  %549 = vmatprep.mubr.f32.mxu1 %v877_v0 }
  0x41   : > { %707 = vmatmul.mubr.msk.f32.gmra.mrb[14].mxu0 %vm334_vm0, %v207_v46  ;;  %716 = vmatmul.mubr.msk.f32.gmra.mrb[14].mxu1 %vm334_vm0, %v216_v47 }
  0x42   : > { %501 = vmatprep.mubr.f32.mxu0 %v877_v0  ;;  %555 = vmatprep.mubr.f32.mxu1 %v877_v0 }
  0x45   : > { %708 = vmatmul.mubr.msk.f32.gmra.mrb[16].mxu0 %vm334_vm0, %v208_v48  ;;  %717 = vmatmul.mubr.msk.f32.gmra.mrb[16].mxu1 %vm334_vm0, %v217_v49 }
  0x90   : > { %v247_v50 = vpop.permute.xlu0 %246  ;;  %v257_v51 = vpop.permute.xlu1 %256 }
  0x94   : > { %v252_v52 = vpop.permute.xlu0 %251  ;;  %v262_v53 = vpop.permute.xlu1 %261 }
  0x98   : > { %v1106_v54 = vpop.permute.xlu0 %266  ;;  %v1108_v55 = vpop.permute.xlu1 %271 }
  0x9f   : > { %v1110_v56 = vpop.permute.xlu0 %276  ;;  %v1112_v57 = vpop.permute.xlu1 %281 }
  0xa3   : > { %v1117_v58 = vpop.permute.xlu0 %286  ;;  %v292_v59 = vpop.permute.xlu1 %291 }
  0xa7   : > { %v297_v4 = vpop.permute.xlu0 %296  ;;  %v302_v13 = vpop.permute.xlu1 %301 }
  0xab   : > { %v307_v22 = vpop.permute.xlu0 %306  ;;  %v312_v31 = vpop.permute.xlu1 %311 }
  0xaf   : > { %v317_v40 = vpop.permute.xlu0 %316  ;;  %v322_v49 = vpop.permute.xlu1 %321 }
  0xf8   : > { %v455_v60 = vpop.f32.mrb[0].mxu0  ;;  %v509_v61 = vpop.f32.mrb[0].mxu1 }
  0xf9   : > { %v456_v62 = vadd.f32 %v455_v60, %v247_v50  ;;  %v510_v63 = vadd.f32 %v509_v61, %v292_v59  ;;  %v457_v0 = vpop.f32.mrb[1].mxu0  ;;  %v511_v1 = vpop.f32.mrb[1].mxu1 }
  0xfa   : > { %v458_v2 = vadd.f32 %v457_v0, %v247_v50  ;;  %v512_v3 = vadd.f32 %v511_v1, %v292_v59  ;;  %v327_v61 = vpop.permute.xlu0 %326 }
  0xfb   : > { %562 = vst [vmem:[%s1119_s10] sm:$0xff] %v456_v62  ;;  %580 = vst [vmem:[%s1119_s10 + $0x90] sm:$0xff] %v510_v63 }
  0xfc   : > { %563 = vst [vmem:[%s1119_s10 + $0x8] sm:$0xff] %v458_v2  ;;  %581 = vst [vmem:[%s1119_s10 + $0x98] sm:$0xff] %v512_v3  ;;  %v461_v5 = vpop.f32.mrb[2].mxu0  ;;  %v515_v6 = vpop.f32.mrb[2].mxu1 }
  0xfd   : > { %v462_v7 = vadd.f32 %v461_v5, %v252_v52  ;;  %v516_v8 = vadd.f32 %v515_v6, %v297_v4  ;;  %v463_v9 = vpop.f32.mrb[3].mxu0  ;;  %v517_v10 = vpop.f32.mrb[3].mxu1 }
  0xfe   : > { %v464_v11 = vadd.f32 %v463_v9, %v252_v52  ;;  %v518_v12 = vadd.f32 %v517_v10, %v297_v4  ;;  %v332_v5 = vpop.permute.xlu1 %331 }
  0xff   : > { %564 = vst [vmem:[%s1119_s10 + $0x10] sm:$0xff] %v462_v7  ;;  %582 = vst [vmem:[%s1119_s10 + $0xa0] sm:$0xff] %v516_v8 }
 0x100   : > { %565 = vst [vmem:[%s1119_s10 + $0x18] sm:$0xff] %v464_v11  ;;  %583 = vst [vmem:[%s1119_s10 + $0xa8] sm:$0xff] %v518_v12  ;;  %v467_v14 = vpop.f32.mrb[4].mxu0  ;;  %v521_v15 = vpop.f32.mrb[4].mxu1 }
 0x101   : > { %v468_v16 = vadd.f32 %v467_v14, %v257_v51  ;;  %v522_v17 = vadd.f32 %v521_v15, %v302_v13  ;;  %v469_v18 = vpop.f32.mrb[5].mxu0  ;;  %v523_v19 = vpop.f32.mrb[5].mxu1 }
 0x102   : > { %v470_v20 = vadd.f32 %v469_v18, %v257_v51  ;;  %v524_v21 = vadd.f32 %v523_v19, %v302_v13 }
 0x103   : > { %566 = vst [vmem:[%s1119_s10 + $0x20] sm:$0xff] %v468_v16  ;;  %584 = vst [vmem:[%s1119_s10 + $0xb0] sm:$0xff] %v522_v17 }
 0x104   : > { %567 = vst [vmem:[%s1119_s10 + $0x28] sm:$0xff] %v470_v20  ;;  %585 = vst [vmem:[%s1119_s10 + $0xb8] sm:$0xff] %v524_v21  ;;  %v473_v23 = vpop.f32.mrb[6].mxu0  ;;  %v527_v24 = vpop.f32.mrb[6].mxu1 }
 0x105   : > { %v474_v25 = vadd.f32 %v473_v23, %v262_v53  ;;  %v528_v26 = vadd.f32 %v527_v24, %v307_v22  ;;  %v475_v27 = vpop.f32.mrb[7].mxu0  ;;  %v529_v28 = vpop.f32.mrb[7].mxu1 }
 0x106   : > { %v476_v29 = vadd.f32 %v475_v27, %v262_v53  ;;  %v530_v30 = vadd.f32 %v529_v28, %v307_v22 }
 0x107   : > { %568 = vst [vmem:[%s1119_s10 + $0x30] sm:$0xff] %v474_v25  ;;  %586 = vst [vmem:[%s1119_s10 + $0xc0] sm:$0xff] %v528_v26 }
 0x108   : > { %569 = vst [vmem:[%s1119_s10 + $0x38] sm:$0xff] %v476_v29  ;;  %587 = vst [vmem:[%s1119_s10 + $0xc8] sm:$0xff] %v530_v30  ;;  %v479_v32 = vpop.f32.mrb[8].mxu0  ;;  %v533_v33 = vpop.f32.mrb[8].mxu1 }
 0x109   : > { %v480_v34 = vadd.f32 %v479_v32, %v1106_v54  ;;  %v534_v35 = vadd.f32 %v533_v33, %v312_v31  ;;  %v481_v36 = vpop.f32.mrb[9].mxu0  ;;  %v535_v37 = vpop.f32.mrb[9].mxu1 }
 0x10a   : > { %v482_v38 = vadd.f32 %v481_v36, %v1106_v54  ;;  %v536_v39 = vadd.f32 %v535_v37, %v312_v31 }
 0x10b   : > { %570 = vst [vmem:[%s1119_s10 + $0x40] sm:$0xff] %v480_v34  ;;  %588 = vst [vmem:[%s1119_s10 + $0xd0] sm:$0xff] %v534_v35 }
 0x10c   : > { %571 = vst [vmem:[%s1119_s10 + $0x48] sm:$0xff] %v482_v38  ;;  %589 = vst [vmem:[%s1119_s10 + $0xd8] sm:$0xff] %v536_v39  ;;  %v485_v41 = vpop.f32.mrb[10].mxu0  ;;  %v539_v42 = vpop.f32.mrb[10].mxu1 }
 0x10d   : > { %v486_v43 = vadd.f32 %v485_v41, %v1108_v55  ;;  %v540_v44 = vadd.f32 %v539_v42, %v317_v40  ;;  %v487_v45 = vpop.f32.mrb[11].mxu0  ;;  %v541_v46 = vpop.f32.mrb[11].mxu1 }
 0x10e   : > { %v488_v47 = vadd.f32 %v487_v45, %v1108_v55  ;;  %v542_v48 = vadd.f32 %v541_v46, %v317_v40 }
 0x10f   : > { %572 = vst [vmem:[%s1119_s10 + $0x50] sm:$0xff] %v486_v43  ;;  %590 = vst [vmem:[%s1119_s10 + $0xe0] sm:$0xff] %v540_v44 }
 0x110   : > { %573 = vst [vmem:[%s1119_s10 + $0x58] sm:$0xff] %v488_v47  ;;  %591 = vst [vmem:[%s1119_s10 + $0xe8] sm:$0xff] %v542_v48  ;;  %v491_v50 = vpop.f32.mrb[12].mxu0  ;;  %v545_v51 = vpop.f32.mrb[12].mxu1 }
 0x111   : > { %v492_v52 = vadd.f32 %v491_v50, %v1110_v56  ;;  %v546_v53 = vadd.f32 %v545_v51, %v322_v49  ;;  %v493_v54 = vpop.f32.mrb[13].mxu0  ;;  %v547_v59 = vpop.f32.mrb[13].mxu1 }
 0x112   : > { %v494_v55 = vadd.f32 %v493_v54, %v1110_v56  ;;  %v548_v60 = vadd.f32 %v547_v59, %v322_v49 }
 0x113   : > { %574 = vst [vmem:[%s1119_s10 + $0x60] sm:$0xff] %v492_v52  ;;  %592 = vst [vmem:[%s1119_s10 + $0xf0] sm:$0xff] %v546_v53 }
 0x114   : > { %575 = vst [vmem:[%s1119_s10 + $0x68] sm:$0xff] %v494_v55  ;;  %593 = vst [vmem:[%s1119_s10 + $0xf8] sm:$0xff] %v548_v60  ;;  %v497_v62 = vpop.f32.mrb[14].mxu0  ;;  %v551_v63 = vpop.f32.mrb[14].mxu1 }
 0x115   : > { %v498_v0 = vadd.f32 %v497_v62, %v1112_v57  ;;  %v552_v1 = vadd.f32 %v551_v63, %v327_v61  ;;  %v499_v2 = vpop.f32.mrb[15].mxu0  ;;  %v553_v3 = vpop.f32.mrb[15].mxu1 }
 0x116   : > { %v500_v56 = vadd.f32 %v499_v2, %v1112_v57  ;;  %v554_v4 = vadd.f32 %v553_v3, %v327_v61 }
 0x117   : > { %576 = vst [vmem:[%s1119_s10 + $0x70] sm:$0xff] %v498_v0  ;;  %594 = vst [vmem:[%s1119_s10 + $0x100] sm:$0xff] %v552_v1 }
 0x118   : > { %577 = vst [vmem:[%s1119_s10 + $0x78] sm:$0xff] %v500_v56  ;;  %595 = vst [vmem:[%s1119_s10 + $0x108] sm:$0xff] %v554_v4  ;;  %v503_v6 = vpop.f32.mrb[16].mxu0  ;;  %v557_v7 = vpop.f32.mrb[16].mxu1 }
 0x119   : > { %v504_v8 = vadd.f32 %v503_v6, %v1117_v58  ;;  %v558_v9 = vadd.f32 %v557_v7, %v332_v5  ;;  %v505_v10 = vpop.f32.mrb[17].mxu0  ;;  %v559_v57 = vpop.f32.mrb[17].mxu1 }
 0x11a   : > { %v506_v11 = vadd.f32 %v505_v10, %v1117_v58  ;;  %v560_v12 = vadd.f32 %v559_v57, %v332_v5 }
 0x11b   : > { %578 = vst [vmem:[%s1119_s10 + $0x80] sm:$0xff] %v504_v8  ;;  %596 = vst [vmem:[%s1119_s10 + $0x110] sm:$0xff] %v558_v9 }
 0x11c   : > { %579 = vst [vmem:[%s1119_s10 + $0x88] sm:$0xff] %v506_v11  ;;  %597 = vst [vmem:[%s1119_s10 + $0x118] sm:$0xff] %v560_v12 }
 0x11d   : > { %810 = shalt.err (!%p807_p5)
}
 0x11e   : > { %s811_s30 = scalar_lea.hbm %s1167_s21, 4608  ;;  %s815_s6 = scalar_lea.hbm %s1227_s3, 9216 }
 0x11f   : > { %p812_p6 = scmp.ne.s32.totalorder %s1167_s21, %s811_s30  ;;  %p816_p10 = scmp.lt.u32.totalorder %s1167_s21, %s1227_s3 }
 0x120   : > { %p817_p11 = scmp.lt.u32.totalorder %s815_s6, %s811_s30  ;;  %p819_p13 = scmp.lt.u32.totalorder %s811_s30, %s1167_s21 }
 0x121   : > { %p813_p7 = pnand %p812_p6, %p942_p4 }
 0x122   : > { %p818_p12 = por %p817_p11, %p816_p10 }
 0x123   : > { %p814_p9 = pneg %p813_p7 }
 0x124   : > { %p820_p0 = por %p819_p13, %p818_p12 }
 0x126   : > { %p821_p1 = pnand %p820_p0, %p814_p9 }
 0x128   : > { %824 = shalt.err (!%p821_p1)
}
 0x129   : > { %s880_s9 = smov 256   ;;  %s881_s10 = smov 16  }
 0x12a   : > { %736 = dma.vmem_to_hbm [thread:$0]  (%p942_p4), %s1169_s18, 4608, %s1167_s21, %s1178_s23, %s880_s9, %s880_s9, %s881_s10  }
 0x12b PF: > { %p742_p2 = scmp.ge.s32.totalorder %s875_s17, 2  ;;  %s629_s11 = sand.u32 1, %s855_s12  }
 0x12c   : > { %s630_s15 = scalar_lea.sflag [#allocation3], %s629_s11 }
 0x12d   : > { %p739_p3 = pnand %p742_p2, %p949_p8 }
 0x12f   : > { %850 = dma.done.wait (!%p739_p3), %s630_s15, 4608  }
 0x130   : > { %852 = vsyncadd (!%p739_p3), %s630_s15, 4294962688  ;;  %s16_s17 = sadd.s32 1, %s875_s17   ;;  %s1230_s12 = smov %s859_s13 }
 0x131   : > { %p13_p5 = scmp.ge.s32.totalorder %s16_s17, 4   ;;  %s1231_s13 = smov %s863_s14 }
 0x132   : > { %s1232_s14 = smov %s955_s25  ;;  %s1233_s15 = smov %s871_s16 }
 0x133   : > { %s1234_s16 = smov %s1236_s20  ;;  %15 = sbr.rel (!%p13_p5) target bundleno = 4 (0x4), region = 67 }
 0x13a   :  { %635 = vsyncpa [#allocation3], 1 }
 0x13b   :  { %637 = vsyncpa [#allocation3 + $0x1], 1 }

// kernel: tpu_custom_call.1
= control target key start
LH: loop header
LB: loop body
LE: loop exit
PB: predicated region body
PF: predicated region fallthrough
CT: control target
= control target key end

     0   :  { %8 = vsyncpa [#allocation3], 0  ;;  %s1224_s0 = inlined_call_operand.vmem [shape: f32[2,32,256], index: 0, kind: input, shape index: {}]   ;;  %s1225_s1 = inlined_call_operand.vmem [shape: f32[144,32], index: 1, kind: input, shape index: {}]   ;;  %s1226_s2 = inlined_call_operand.vmem [shape: f32[144,1], index: 2, kind: input, shape index: {}]   ;;  %s1227_s3 = inlined_call_operand.hbm [shape: f32[2,144,256], index: 3, kind: output, shape index: {}]  }
   0x1   :  { %10 = vsyncpa [#allocation3 + $0x1], 0  ;;  %s902_s12 = smov 0   ;;  %s904_s13 = smov 0  }
   0x2   :  { %s906_s14 = smov 0   ;;  %s908_s15 = smov 0  }
   0x3   :  { %s910_s16 = smov 0   ;;  %s912_s17 = smov 0  }
   0x4 LB: > { %s693_s18 = sadd.s32 4294967295, %s875_s17   ;;  %s694_s19 = sadd.s32 4294967294, %s875_s17   ;;  %s875_s17 = sphi %s912_s17, %s16_s17   ;;  %s871_s16 = sphi %s910_s16, %s1234_s16   ;;  %s867_s15 = sphi %s908_s15, %s1233_s15   ;;  %s863_s14 = sphi %s906_s14, %s1232_s14   ;;  %s859_s13 = sphi %s904_s13, %s1231_s13   ;;  %s855_s12 = sphi %s902_s12, %s1230_s12  }
   0x5   : > { %s28_s20 = sadd.s32 1, %s871_s16  ;;  %s107_s21 = sadd.s32 1, %s863_s14 }
   0x6   : > { %p30_p0 = scmp.ge.s32.totalorder %s28_s20, 2  ;;  %p117_p1 = scmp.ne.s32.totalorder %s863_s14, %s859_s13 }
   0x7   : > { %p118_p2 = scmp.eq.s32.totalorder %s693_s18, 1  ;;  %p123_p3 = scmp.ne.s32.totalorder %s859_s13, %s855_s12 }
   0x8   : > { %s1236_s20 = smov (%p30_p0, %s28_s20), 0  ;;  %p124_p5 = scmp.eq.s32.totalorder %s694_s19, 1 }
   0x9   : > { %p942_p4 = por %p118_p2, %p117_p1  ;;  %s102_s23 = ssub.s32 %s871_s16, %s1236_s20 }
   0xa   : > { %p697_p6 = scmp.ge.s32.totalorder %s875_s17, 1  ;;  %p105_p7 = scmp.eq.s32.totalorder %s102_s23, 0 }
   0xb   : > { %p949_p8 = por %p124_p5, %p123_p3  ;;  %p161_p9 = scmp.lt.s32.totalorder %s875_s17, 3 }
   0xc   : > { %s955_s25 = scalar_select %p105_p7, %s863_s14, %s107_s21  }
   0xd   : > { %p162_p10 = pnand %p697_p6, %p161_p9 }
   0xe   : > { %p190_p11 = scmp.lt.s32.totalorder (!%p162_p10), %s867_s15, 1  ;;  %v877_v0 = vmov (!%p162_p10), 0.0   ;;  %v878_v1 = vmov (!%p162_p10), 0   ;;  %v228_v13 = vld [vmem:[%s1226_s2 + $0x10] sm:$0xff] (!%p162_p10)  ;;  %v226_v14 = vld [vmem:[%s1226_s2] sm:$0xff] (!%p162_p10)  ;;  %v229_v16 = vld [vmem:[%s1226_s2 + $0x18] sm:$0xff] (!%p162_p10) }
   0xf   : > { %165 = sbr.rel (%p162_p10) target bundleno = 299 (0x12b), region = 32  ;;  %453 = vmatprep.mubr.f32.mxu0 (!%p162_p10), %v877_v0  ;;  %507 = vmatprep.mubr.f32.mxu1 (!%p162_p10), %v877_v0  ;;  %v227_v17 = vld [vmem:[%s1226_s2 + $0x8] sm:$0xff] (!%p162_p10)  ;;  %v200_v18 = vld [vmem:[%s1225_s1] sm:$0xff] (!%p162_p10)  ;;  %vm334_vm0 = vcmask (!%p162_p10), 261120   ;;  %v210_v23 = vld [vmem:[%s1225_s1 + $0x50] sm:$0xff] (!%p162_p10)  ;;  %s186_s8 = sand.u32 (!%p162_p10), 1, %s859_s13  }
  0x10   : > { %796 = vset.pattern.permute.xlu1 (!%p162_p10), %v878_v1  ;;  %795 = vset.pattern.permute.xlu0 (!%p162_p10), %v878_v1  ;;  %v209_v19 = vld [vmem:[%s1225_s1 + $0x48] sm:$0xff] (!%p162_p10)  ;;  %v230_v21 = vld [vmem:[%s1226_s2 + $0x20] sm:$0xff] (!%p162_p10)  ;;  %v233_v24 = vld [vmem:[%s1226_s2 + $0x38] sm:$0xff] (!%p162_p10)  ;;  %s734_s9 = smul.u32 (!%p162_p10), 288, %s186_s8  ;;  %s1178_s23 = scalar_lea.sflag (!%p162_p10), [#allocation3], %s186_s8 }
  0x11   : > { %256 = vperm.xlu1 (!%p162_p10), %796, %v228_v13   ;;  %246 = vperm.xlu0 (!%p162_p10), %795, %v226_v14   ;;  %v231_v20 = vld [vmem:[%s1226_s2 + $0x28] sm:$0xff] (!%p162_p10)  ;;  %v232_v25 = vld [vmem:[%s1226_s2 + $0x30] sm:$0xff] (!%p162_p10)  ;;  %v211_v27 = vld [vmem:[%s1225_s1 + $0x58] sm:$0xff] (!%p162_p10)  ;;  %s735_s11 = smul.u32 (!%p162_p10), 4608, %s867_s15 }
  0x12   : > { %v201_v22 = vld [vmem:[%s1225_s1 + $0x8] sm:$0xff] (!%p162_p10)  ;;  %v202_v26 = vld [vmem:[%s1225_s1 + $0x10] sm:$0xff] (!%p162_p10)  ;;  %v234_v29 = vld [vmem:[%s1226_s2 + $0x40] sm:$0xff] (!%p162_p10)  ;;  %s1119_s10 = scalar_lea.vmem (!%p162_p10), [#allocation2], %s734_s9 }
  0x13   : > { %v235_v28 = vld [vmem:[%s1226_s2 + $0x48] sm:$0xff] (!%p162_p10)  ;;  %v203_v30 = vld [vmem:[%s1225_s1 + $0x18] sm:$0xff] (!%p162_p10)  ;;  %v212_v31 = vld [vmem:[%s1225_s1 + $0x60] sm:$0xff] (!%p162_p10)  ;;  %s614_s18 = sshll.u32 (!%p162_p10), %s1119_s10, 4  ;;  %s1167_s21 = scalar_lea.hbm (!%p162_p10), %s1227_s3, %s735_s11  ;;  %s1169_s18 = int_to_ptr.vmem [resolvable:$true] %s614_s18 }
  0x14   : > { %v237_v32 = vld [vmem:[%s1226_s2 + $0x58] sm:$0xff] (!%p162_p10)  ;;  %v236_v33 = vld [vmem:[%s1226_s2 + $0x50] sm:$0xff] (!%p162_p10)  ;;  %v204_v34 = vld [vmem:[%s1225_s1 + $0x20] sm:$0xff] (!%p162_p10) }
  0x15   : > { %261 = vperm.xlu1 (!%p162_p10), %796, %v229_v16   ;;  %251 = vperm.xlu0 (!%p162_p10), %795, %v227_v17   ;;  %v213_v35 = vld [vmem:[%s1225_s1 + $0x68] sm:$0xff] (!%p162_p10)  ;;  %v238_v37 = vld [vmem:[%s1226_s2 + $0x60] sm:$0xff] (!%p162_p10)  ;;  %v214_v39 = vld [vmem:[%s1225_s1 + $0x70] sm:$0xff] (!%p162_p10) }
  0x16   : > { %s191_s26 = scalar_select %p190_p11, %s867_s15, 1  ;;  %v239_v36 = vld [vmem:[%s1226_s2 + $0x68] sm:$0xff]  ;;  %v241_v40 = vld [vmem:[%s1226_s2 + $0x78] sm:$0xff]  ;;  %v240_v41 = vld [vmem:[%s1226_s2 + $0x70] sm:$0xff] }
  0x17   : > { %v205_v38 = vld [vmem:[%s1225_s1 + $0x28] sm:$0xff]  ;;  %v206_v42 = vld [vmem:[%s1225_s1 + $0x30] sm:$0xff]  ;;  %v215_v43 = vld [vmem:[%s1225_s1 + $0x78] sm:$0xff] }
  0x18   : > { %s721_s27 = sshll.u32 %s191_s26, 6  ;;  %v243_v44 = vld [vmem:[%s1226_s2 + $0x88] sm:$0xff]  ;;  %v242_v45 = vld [vmem:[%s1226_s2 + $0x80] sm:$0xff]  ;;  %v207_v46 = vld [vmem:[%s1225_s1 + $0x38] sm:$0xff]  ;;  %s797_s26 = scalar_lea.vmem %s1169_s18, 4608 }
  0x19   : > { %s197_s30 = scalar_lea.vmem %s1224_s0, %s721_s27  ;;  %271 = vperm.xlu1 %796, %v231_v20   ;;  %266 = vperm.xlu0 %795, %v230_v21   ;;  %v216_v47 = vld [vmem:[%s1225_s1 + $0x80] sm:$0xff]  ;;  %v217_v49 = vld [vmem:[%s1225_s1 + $0x88] sm:$0xff]  ;;  %p798_p12 = scmp.ne.s32.totalorder %s1169_s18, %s797_s26 }
  0x1a   : > { %v219_v2 = vld [vmem:[%s197_s30 + $0x8] sm:$0xff]  ;;  %v221_v3 = vld [vmem:[%s197_s30 + $0x18] sm:$0xff]  ;;  %v218_v4 = vld [vmem:[%s197_s30] sm:$0xff]  ;;  %s879_s27 = smov [#allocation2]  }
  0x1b   : > { %v722_v5 = vpack.c.bf16 %v221_v3, %v219_v2  ;;  %v220_v6 = vld [vmem:[%s197_s30 + $0x10] sm:$0xff]  ;;  %v223_v7 = vld [vmem:[%s197_s30 + $0x28] sm:$0xff]  ;;  %v225_v8 = vld [vmem:[%s197_s30 + $0x38] sm:$0xff]  ;;  %p799_p13 = pnand %p798_p12, %p942_p4  ;;  %s801_s28 = sshll.u32 %s879_s27, 4  ;;  %s802_s28 = int_to_ptr.vmem [resolvable:$false] %s801_s28 }
  0x1c   : > { %v724_v9 = vpack.c.bf16 %v220_v6, %v218_v4  ;;  %v726_v10 = vpack.c.bf16 %v225_v8, %v223_v7  ;;  %v222_v11 = vld [vmem:[%s197_s30 + $0x20] sm:$0xff]  ;;  %v224_v12 = vld [vmem:[%s197_s30 + $0x30] sm:$0xff]  ;;  %s803_s29 = scalar_lea.vmem %s802_s28, 9216  ;;  %p804_p1 = scmp.lt.s32.totalorder %s1169_s18, %s802_s28 }
  0x1d   : > { %723 = vmatprep.subr.bf16.mxu0 %v722_v5  ;;  %730 = vmatprep.subr.bf16.mxu1 %v722_v5  ;;  %v728_v15 = vpack.c.bf16 %v224_v12, %v222_v11  ;;  %v208_v48 = vld [vmem:[%s1225_s1 + $0x40] sm:$0xff]  ;;  %p800_p0 = pneg %p799_p13  ;;  %p805_p2 = scmp.lt.s32.totalorder %s803_s29, %s797_s26 }
  0x1e   : > { %725 = vmatpush1.bf16.msra.mxu0 %v724_v9  ;;  %732 = vmatpush1.bf16.msra.mxu1 %v724_v9 }
  0x1f   : > { %727 = vmatprep.subr.bf16.mxu0 %v726_v10  ;;  %731 = vmatprep.subr.bf16.mxu1 %v726_v10  ;;  %p806_p3 = por %p805_p2, %p804_p1 }
  0x20   : > { %281 = vperm.xlu1 %796, %v233_v24   ;;  %276 = vperm.xlu0 %795, %v232_v25  }
  0x21   : > { %p807_p5 = pnand %p806_p3, %p800_p0 }
  0x22   : > { %729 = vmatpush1.bf16.msra.mxu0 %v728_v15  ;;  %733 = vmatpush1.bf16.msra.mxu1 %v728_v15 }
  0x24   : > { %291 = vperm.xlu1 %796, %v235_v28   ;;  %286 = vperm.xlu0 %795, %v234_v29  }
  0x25   : > { %700 = vmatmul.mubr.msk.f32.vlgmr.msra.gmra.mrb[0].mxu0 %vm334_vm0, %v200_v18  ;;  %709 = vmatmul.mubr.msk.f32.vlgmr.msra.gmra.mrb[0].mxu1 %vm334_vm0, %v209_v19 }
  0x26   : > { %459 = vmatprep.mubr.f32.mxu0 %v877_v0  ;;  %513 = vmatprep.mubr.f32.mxu1 %v877_v0 }
  0x28   : > { %301 = vperm.xlu1 %796, %v237_v32   ;;  %296 = vperm.xlu0 %795, %v236_v33  }
  0x29   : > { %701 = vmatmul.mubr.msk.f32.gmra.mrb[2].mxu0 %vm334_vm0, %v201_v22  ;;  %710 = vmatmul.mubr.msk.f32.gmra.mrb[2].mxu1 %vm334_vm0, %v210_v23 }
  0x2a   : > { %465 = vmatprep.mubr.f32.mxu0 %v877_v0  ;;  %519 = vmatprep.mubr.f32.mxu1 %v877_v0 }
  0x2c   : > { %311 = vperm.xlu1 %796, %v239_v36   ;;  %306 = vperm.xlu0 %795, %v238_v37  }
  0x2d   : > { %702 = vmatmul.mubr.msk.f32.gmra.mrb[4].mxu0 %vm334_vm0, %v202_v26  ;;  %711 = vmatmul.mubr.msk.f32.gmra.mrb[4].mxu1 %vm334_vm0, %v211_v27 }
  0x2e   : > { %471 = vmatprep.mubr.f32.mxu0 %v877_v0  ;;  %525 = vmatprep.mubr.f32.mxu1 %v877_v0 }
  0x30   : > { %321 = vperm.xlu1 %796, %v241_v40   ;;  %316 = vperm.xlu0 %795, %v240_v41  }
  0x31   : > { %703 = vmatmul.mubr.msk.f32.gmra.mrb[6].mxu0 %vm334_vm0, %v203_v30  ;;  %712 = vmatmul.mubr.msk.f32.gmra.mrb[6].mxu1 %vm334_vm0, %v212_v31 }
  0x32   : > { %477 = vmatprep.mubr.f32.mxu0 %v877_v0  ;;  %531 = vmatprep.mubr.f32.mxu1 %v877_v0 }
  0x34   : > { %331 = vperm.xlu1 %796, %v243_v44   ;;  %326 = vperm.xlu0 %795, %v242_v45  }
  0x35   : > { %704 = vmatmul.mubr.msk.f32.gmra.mrb[8].mxu0 %vm334_vm0, %v204_v34  ;;  %713 = vmatmul.mubr.msk.f32.gmra.mrb[8].mxu1 %vm334_vm0, %v213_v35 }
  0x36   : > { %483 = vmatprep.mubr.f32.mxu0 %v877_v0  ;;  %537 = vmatprep.mubr.f32.mxu1 %v877_v0 }
  0x39   : > { %705 = vmatmul.mubr.msk.f32.gmra.mrb[10].mxu0 %vm334_vm0, %v205_v38  ;;  %714 = vmatmul.mubr.msk.f32.gmra.mrb[10].mxu1 %vm334_vm0, %v214_v39 }
  0x3a   : > { %489 = vmatprep.mubr.f32.mxu0 %v877_v0  ;;  %543 = vmatprep.mubr.f32.mxu1 %v877_v0 }
  0x3d   : > { %706 = vmatmul.mubr.msk.f32.gmra.mrb[12].mxu0 %vm334_vm0, %v206_v42  ;;  %715 = vmatmul.mubr.msk.f32.gmra.mrb[12].mxu1 %vm334_vm0, %v215_v43 }
  0x3e   : > { %495 = vmatprep.mubr.f32.mxu0 %v877_v0  ;;  %549 = vmatprep.mubr.f32.mxu1 %v877_v0 }
  0x41   : > { %707 = vmatmul.mubr.msk.f32.gmra.mrb[14].mxu0 %vm334_vm0, %v207_v46  ;;  %716 = vmatmul.mubr.msk.f32.gmra.mrb[14].mxu1 %vm334_vm0, %v216_v47 }
  0x42   : > { %501 = vmatprep.mubr.f32.mxu0 %v877_v0  ;;  %555 = vmatprep.mubr.f32.mxu1 %v877_v0 }
  0x45   : > { %708 = vmatmul.mubr.msk.f32.gmra.mrb[16].mxu0 %vm334_vm0, %v208_v48  ;;  %717 = vmatmul.mubr.msk.f32.gmra.mrb[16].mxu1 %vm334_vm0, %v217_v49 }
  0x90   : > { %v247_v50 = vpop.permute.xlu0 %246  ;;  %v257_v51 = vpop.permute.xlu1 %256 }
  0x94   : > { %v252_v52 = vpop.permute.xlu0 %251  ;;  %v262_v53 = vpop.permute.xlu1 %261 }
  0x98   : > { %v1106_v54 = vpop.permute.xlu0 %266  ;;  %v1108_v55 = vpop.permute.xlu1 %271 }
  0x9f   : > { %v1110_v56 = vpop.permute.xlu0 %276  ;;  %v1112_v57 = vpop.permute.xlu1 %281 }
  0xa3   : > { %v1117_v58 = vpop.permute.xlu0 %286  ;;  %v292_v59 = vpop.permute.xlu1 %291 }
  0xa7   : > { %v297_v4 = vpop.permute.xlu0 %296  ;;  %v302_v13 = vpop.permute.xlu1 %301 }
  0xab   : > { %v307_v22 = vpop.permute.xlu0 %306  ;;  %v312_v31 = vpop.permute.xlu1 %311 }
  0xaf   : > { %v317_v40 = vpop.permute.xlu0 %316  ;;  %v322_v49 = vpop.permute.xlu1 %321 }
  0xf8   : > { %v455_v60 = vpop.f32.mrb[0].mxu0  ;;  %v509_v61 = vpop.f32.mrb[0].mxu1 }
  0xf9   : > { %v456_v62 = vadd.f32 %v455_v60, %v247_v50  ;;  %v510_v63 = vadd.f32 %v509_v61, %v292_v59  ;;  %v457_v0 = vpop.f32.mrb[1].mxu0  ;;  %v511_v1 = vpop.f32.mrb[1].mxu1 }
  0xfa   : > { %v458_v2 = vadd.f32 %v457_v0, %v247_v50  ;;  %v512_v3 = vadd.f32 %v511_v1, %v292_v59  ;;  %v327_v61 = vpop.permute.xlu0 %326 }
  0xfb   : > { %562 = vst [vmem:[%s1119_s10] sm:$0xff] %v456_v62  ;;  %580 = vst [vmem:[%s1119_s10 + $0x90] sm:$0xff] %v510_v63 }
  0xfc   : > { %563 = vst [vmem:[%s1119_s10 + $0x8] sm:$0xff] %v458_v2  ;;  %581 = vst [vmem:[%s1119_s10 + $0x98] sm:$0xff] %v512_v3  ;;  %v461_v5 = vpop.f32.mrb[2].mxu0  ;;  %v515_v6 = vpop.f32.mrb[2].mxu1 }
  0xfd   : > { %v462_v7 = vadd.f32 %v461_v5, %v252_v52  ;;  %v516_v8 = vadd.f32 %v515_v6, %v297_v4  ;;  %v463_v9 = vpop.f32.mrb[3].mxu0  ;;  %v517_v10 = vpop.f32.mrb[3].mxu1 }
  0xfe   : > { %v464_v11 = vadd.f32 %v463_v9, %v252_v52  ;;  %v518_v12 = vadd.f32 %v517_v10, %v297_v4  ;;  %v332_v5 = vpop.permute.xlu1 %331 }
  0xff   : > { %564 = vst [vmem:[%s1119_s10 + $0x10] sm:$0xff] %v462_v7  ;;  %582 = vst [vmem:[%s1119_s10 + $0xa0] sm:$0xff] %v516_v8 }
 0x100   : > { %565 = vst [vmem:[%s1119_s10 + $0x18] sm:$0xff] %v464_v11  ;;  %583 = vst [vmem:[%s1119_s10 + $0xa8] sm:$0xff] %v518_v12  ;;  %v467_v14 = vpop.f32.mrb[4].mxu0  ;;  %v521_v15 = vpop.f32.mrb[4].mxu1 }
 0x101   : > { %v468_v16 = vadd.f32 %v467_v14, %v257_v51  ;;  %v522_v17 = vadd.f32 %v521_v15, %v302_v13  ;;  %v469_v18 = vpop.f32.mrb[5].mxu0  ;;  %v523_v19 = vpop.f32.mrb[5].mxu1 }
 0x102   : > { %v470_v20 = vadd.f32 %v469_v18, %v257_v51  ;;  %v524_v21 = vadd.f32 %v523_v19, %v302_v13 }
 0x103   : > { %566 = vst [vmem:[%s1119_s10 + $0x20] sm:$0xff] %v468_v16  ;;  %584 = vst [vmem:[%s1119_s10 + $0xb0] sm:$0xff] %v522_v17 }
 0x104   : > { %567 = vst [vmem:[%s1119_s10 + $0x28] sm:$0xff] %v470_v20  ;;  %585 = vst [vmem:[%s1119_s10 + $0xb8] sm:$0xff] %v524_v21  ;;  %v473_v23 = vpop.f32.mrb[6].mxu0  ;;  %v527_v24 = vpop.f32.mrb[6].mxu1 }
 0x105   : > { %v474_v25 = vadd.f32 %v473_v23, %v262_v53  ;;  %v528_v26 = vadd.f32 %v527_v24, %v307_v22  ;;  %v475_v27 = vpop.f32.mrb[7].mxu0  ;;  %v529_v28 = vpop.f32.mrb[7].mxu1 }
 0x106   : > { %v476_v29 = vadd.f32 %v475_v27, %v262_v53  ;;  %v530_v30 = vadd.f32 %v529_v28, %v307_v22 }
 0x107   : > { %568 = vst [vmem:[%s1119_s10 + $0x30] sm:$0xff] %v474_v25  ;;  %586 = vst [vmem:[%s1119_s10 + $0xc0] sm:$0xff] %v528_v26 }
 0x108   : > { %569 = vst [vmem:[%s1119_s10 + $0x38] sm:$0xff] %v476_v29  ;;  %587 = vst [vmem:[%s1119_s10 + $0xc8] sm:$0xff] %v530_v30  ;;  %v479_v32 = vpop.f32.mrb[8].mxu0  ;;  %v533_v33 = vpop.f32.mrb[8].mxu1 }
 0x109   : > { %v480_v34 = vadd.f32 %v479_v32, %v1106_v54  ;;  %v534_v35 = vadd.f32 %v533_v33, %v312_v31  ;;  %v481_v36 = vpop.f32.mrb[9].mxu0  ;;  %v535_v37 = vpop.f32.mrb[9].mxu1 }
 0x10a   : > { %v482_v38 = vadd.f32 %v481_v36, %v1106_v54  ;;  %v536_v39 = vadd.f32 %v535_v37, %v312_v31 }
 0x10b   : > { %570 = vst [vmem:[%s1119_s10 + $0x40] sm:$0xff] %v480_v34  ;;  %588 = vst [vmem:[%s1119_s10 + $0xd0] sm:$0xff] %v534_v35 }
 0x10c   : > { %571 = vst [vmem:[%s1119_s10 + $0x48] sm:$0xff] %v482_v38  ;;  %589 = vst [vmem:[%s1119_s10 + $0xd8] sm:$0xff] %v536_v39  ;;  %v485_v41 = vpop.f32.mrb[10].mxu0  ;;  %v539_v42 = vpop.f32.mrb[10].mxu1 }
 0x10d   : > { %v486_v43 = vadd.f32 %v485_v41, %v1108_v55  ;;  %v540_v44 = vadd.f32 %v539_v42, %v317_v40  ;;  %v487_v45 = vpop.f32.mrb[11].mxu0  ;;  %v541_v46 = vpop.f32.mrb[11].mxu1 }
 0x10e   : > { %v488_v47 = vadd.f32 %v487_v45, %v1108_v55  ;;  %v542_v48 = vadd.f32 %v541_v46, %v317_v40 }
 0x10f   : > { %572 = vst [vmem:[%s1119_s10 + $0x50] sm:$0xff] %v486_v43  ;;  %590 = vst [vmem:[%s1119_s10 + $0xe0] sm:$0xff] %v540_v44 }
 0x110   : > { %573 = vst [vmem:[%s1119_s10 + $0x58] sm:$0xff] %v488_v47  ;;  %591 = vst [vmem:[%s1119_s10 + $0xe8] sm:$0xff] %v542_v48  ;;  %v491_v50 = vpop.f32.mrb[12].mxu0  ;;  %v545_v51 = vpop.f32.mrb[12].mxu1 }
 0x111   : > { %v492_v52 = vadd.f32 %v491_v50, %v1110_v56  ;;  %v546_v53 = vadd.f32 %v545_v51, %v322_v49  ;;  %v493_v54 = vpop.f32.mrb[13].mxu0  ;;  %v547_v59 = vpop.f32.mrb[13].mxu1 }
 0x112   : > { %v494_v55 = vadd.f32 %v493_v54, %v1110_v56  ;;  %v548_v60 = vadd.f32 %v547_v59, %v322_v49 }
 0x113   : > { %574 = vst [vmem:[%s1119_s10 + $0x60] sm:$0xff] %v492_v52  ;;  %592 = vst [vmem:[%s1119_s10 + $0xf0] sm:$0xff] %v546_v53 }
 0x114   : > { %575 = vst [vmem:[%s1119_s10 + $0x68] sm:$0xff] %v494_v55  ;;  %593 = vst [vmem:[%s1119_s10 + $0xf8] sm:$0xff] %v548_v60  ;;  %v497_v62 = vpop.f32.mrb[14].mxu0  ;;  %v551_v63 = vpop.f32.mrb[14].mxu1 }
 0x115   : > { %v498_v0 = vadd.f32 %v497_v62, %v1112_v57  ;;  %v552_v1 = vadd.f32 %v551_v63, %v327_v61  ;;  %v499_v2 = vpop.f32.mrb[15].mxu0  ;;  %v553_v3 = vpop.f32.mrb[15].mxu1 }
 0x116   : > { %v500_v56 = vadd.f32 %v499_v2, %v1112_v57  ;;  %v554_v4 = vadd.f32 %v553_v3, %v327_v61 }
 0x117   : > { %576 = vst [vmem:[%s1119_s10 + $0x70] sm:$0xff] %v498_v0  ;;  %594 = vst [vmem:[%s1119_s10 + $0x100] sm:$0xff] %v552_v1 }
 0x118   : > { %577 = vst [vmem:[%s1119_s10 + $0x78] sm:$0xff] %v500_v56  ;;  %595 = vst [vmem:[%s1119_s10 + $0x108] sm:$0xff] %v554_v4  ;;  %v503_v6 = vpop.f32.mrb[16].mxu0  ;;  %v557_v7 = vpop.f32.mrb[16].mxu1 }
 0x119   : > { %v504_v8 = vadd.f32 %v503_v6, %v1117_v58  ;;  %v558_v9 = vadd.f32 %v557_v7, %v332_v5  ;;  %v505_v10 = vpop.f32.mrb[17].mxu0  ;;  %v559_v57 = vpop.f32.mrb[17].mxu1 }
 0x11a   : > { %v506_v11 = vadd.f32 %v505_v10, %v1117_v58  ;;  %v560_v12 = vadd.f32 %v559_v57, %v332_v5 }
 0x11b   : > { %578 = vst [vmem:[%s1119_s10 + $0x80] sm:$0xff] %v504_v8  ;;  %596 = vst [vmem:[%s1119_s10 + $0x110] sm:$0xff] %v558_v9 }
 0x11c   : > { %579 = vst [vmem:[%s1119_s10 + $0x88] sm:$0xff] %v506_v11  ;;  %597 = vst [vmem:[%s1119_s10 + $0x118] sm:$0xff] %v560_v12 }
 0x11d   : > { %810 = shalt.err (!%p807_p5)
}
 0x11e   : > { %s811_s30 = scalar_lea.hbm %s1167_s21, 4608  ;;  %s815_s6 = scalar_lea.hbm %s1227_s3, 9216 }
 0x11f   : > { %p812_p6 = scmp.ne.s32.totalorder %s1167_s21, %s811_s30  ;;  %p816_p10 = scmp.lt.u32.totalorder %s1167_s21, %s1227_s3 }
 0x120   : > { %p817_p11 = scmp.lt.u32.totalorder %s815_s6, %s811_s30  ;;  %p819_p13 = scmp.lt.u32.totalorder %s811_s30, %s1167_s21 }
 0x121   : > { %p813_p7 = pnand %p812_p6, %p942_p4 }
 0x122   : > { %p818_p12 = por %p817_p11, %p816_p10 }
 0x123   : > { %p814_p9 = pneg %p813_p7 }
 0x124   : > { %p820_p0 = por %p819_p13, %p818_p12 }
 0x126   : > { %p821_p1 = pnand %p820_p0, %p814_p9 }
 0x128   : > { %824 = shalt.err (!%p821_p1)
}
 0x129   : > { %s880_s9 = smov 256   ;;  %s881_s10 = smov 16  }
 0x12a   : > { %736 = dma.vmem_to_hbm [thread:$0]  (%p942_p4), %s1169_s18, 4608, %s1167_s21, %s1178_s23, %s880_s9, %s880_s9, %s881_s10  }
 0x12b PF: > { %p742_p2 = scmp.ge.s32.totalorder %s875_s17, 2  ;;  %s629_s11 = sand.u32 1, %s855_s12  }
 0x12c   : > { %s630_s15 = scalar_lea.sflag [#allocation3], %s629_s11 }
 0x12d   : > { %p739_p3 = pnand %p742_p2, %p949_p8 }
 0x12f   : > { %850 = dma.done.wait (!%p739_p3), %s630_s15, 4608  }
 0x130   : > { %852 = vsyncadd (!%p739_p3), %s630_s15, 4294962688  ;;  %s16_s17 = sadd.s32 1, %s875_s17   ;;  %s1230_s12 = smov %s859_s13 }
 0x131   : > { %p13_p5 = scmp.ge.s32.totalorder %s16_s17, 4   ;;  %s1231_s13 = smov %s863_s14 }
 0x132   : > { %s1232_s14 = smov %s955_s25  ;;  %s1233_s15 = smov %s871_s16 }
 0x133   : > { %s1234_s16 = smov %s1236_s20  ;;  %15 = sbr.rel (!%p13_p5) target bundleno = 4 (0x4), region = 67 }
 0x13a   :  { %635 = vsyncpa [#allocation3], 1 }
 0x13b   :  { %637 = vsyncpa [#allocation3 + $0x1], 1 }

</bundles_post_ra>
